<compile_context>
chip_gen: v7x
topology: tpu7x:2x2x1
jax: 0.10.0
libtpu: 0.0.40
codegen_flags: <defaults>
</compile_context>

<pallas_src>
import jax
import jax.numpy as jnp
from jax import lax
from jax.experimental import pallas as pl
from jax.experimental.pallas import tpu as pltpu


def attention_kernel(hid_ref, wq_ref, bq_ref, len_ref, key_ref, val_ref, out_ref):
    # query = hidden @ Wq^T + b : (Bblk, 512) @ (512, 128) on the MXU, f32 acc.
    q = jnp.dot(hid_ref[...], wq_ref[...],
                preferred_element_type=jnp.float32) + bq_ref[...]     # (Bblk, 128)

    key = key_ref[...].astype(jnp.float32)                            # (Bblk, T, 128)
    val = val_ref[...].astype(jnp.float32)                            # (Bblk, T, 128)

    # energy[b, t] = sum_d q[b, d] * key[b, t, d] -- VPU multiply + lane reduce
    # (keeps the M=1 batched matvec off the MXU).
    energy = jnp.sum(q[:, None, :] * key, axis=-1)                    # (Bblk, T)

    # Masked softmax fused with the L1 renormalization: the full-softmax
    # normalizer cancels algebraically, so
    #   attn = mask * exp(e - max) / max(sum(mask * exp(e - max)), eps)
    m = jnp.max(energy, axis=-1, keepdims=True)
    p = jnp.exp(energy - m)

    ids = lax.broadcasted_iota(jnp.int32, energy.shape, 1)            # (Bblk, T)
    mask = (ids < len_ref[...]).astype(jnp.float32)                   # seq_len >= T -> all ones

    masked = mask * p
    denom = jnp.maximum(jnp.sum(masked, axis=-1, keepdims=True), 1e-12)
    attn = masked * pl.reciprocal(denom, approx=True)                 # (Bblk, T)

    # context[b, d] = sum_t attn[b, t] * value[b, t, d] -- sublane reduce.
    ctx = jnp.sum(attn[:, :, None] * val, axis=1)                     # (Bblk, 128)
    out_ref[...] = ctx.astype(out_ref.dtype)


def _choose_block_b(batch, t, d, kv_itemsize, requested):
    """Largest multiple-of-8 batch block whose double-buffered K/V tiles plus
    f32 working copies stay comfortably under the 32 MiB default scoped VMEM."""
    budget = 24 * 1024 * 1024
    # 2 buffers x (K, V) in storage dtype + ~3 f32-sized temporaries per row.
    bytes_per_row = t * d * (2 * 2 * kv_itemsize + 3 * 4)
    fits = max(1, budget // max(bytes_per_row, 1))
    bblk = min(int(requested), int(fits), ((batch + 7) // 8) * 8)
    return max(8, (bblk // 8) * 8)


def attention_forward(key_arr, value_arr, speller_hidden, seq_len, wq, bq, *,
                      block_b=16, storage_dtype=jnp.bfloat16):
    """key_arr/value_arr: [B, T, 128]; speller_hidden: [B, 512]; seq_len: [B] int;
    wq: [128, 512] (PyTorch Linear layout); bq: [128].  Returns [B, 128] f32."""
    B, T, D = key_arr.shape
    H = speller_hidden.shape[1]

    # bf16 storage in HBM for the big operands (memory-bound kernel); the
    # kernel upcasts and does all math in f32.
    key_s = key_arr.astype(storage_dtype)
    val_s = value_arr.astype(storage_dtype)
    hid_s = speller_hidden.astype(storage_dtype)
    wq_t = wq.T.astype(storage_dtype)                 # (512, 128): q = h @ wq_t + b
    bq2 = bq.reshape(1, D).astype(jnp.float32)
    lens = seq_len.astype(jnp.int32).reshape(B, 1)

    bblk = _choose_block_b(B, T, D, jnp.dtype(storage_dtype).itemsize, block_b)
    # TODO(synk): for very long T, add an inner "arbitrary" T grid axis with a
    # flash-style running max/sum instead of holding the whole (Bblk, T, D) tile.

    b_pad = pl.cdiv(B, bblk) * bblk
    if b_pad != B:
        pad = b_pad - B
        key_s = jnp.pad(key_s, ((0, pad), (0, 0), (0, 0)))
        val_s = jnp.pad(val_s, ((0, pad), (0, 0), (0, 0)))
        hid_s = jnp.pad(hid_s, ((0, pad), (0, 0)))
        lens = jnp.pad(lens, ((0, pad), (0, 0)))      # padded rows: seq_len=0 -> attn=0

    grid = (b_pad // bblk,)

    itemsize = jnp.dtype(storage_dtype).itemsize
    kv_bytes = 2 * b_pad * T * D * itemsize
    other_bytes = (b_pad * H + H * D) * itemsize + b_pad * D * 4
    cost = pl.CostEstimate(
        flops=2 * b_pad * (H * D + 2 * T * D),
        transcendentals=b_pad * T,
        bytes_accessed=kv_bytes + other_bytes,
    )

    out = pl.pallas_call(
        attention_kernel,
        out_shape=jax.ShapeDtypeStruct((b_pad, D), jnp.float32),
        grid=grid,
        in_specs=[
            pl.BlockSpec((bblk, H), lambda i: (i, 0)),         # speller_hidden block
            pl.BlockSpec((H, D), lambda i: (0, 0)),            # Wq^T (resident)
            pl.BlockSpec((1, D), lambda i: (0, 0)),            # bias  (resident)
            pl.BlockSpec((bblk, 1), lambda i: (i, 0)),         # seq_len column
            pl.BlockSpec((bblk, T, D), lambda i: (i, 0, 0)),   # key   block
            pl.BlockSpec((bblk, T, D), lambda i: (i, 0, 0)),   # value block
        ],
        out_specs=pl.BlockSpec((bblk, D), lambda i: (i, 0)),
        compiler_params=pltpu.CompilerParams(
            dimension_semantics=("parallel",),    # lets v7x shard the batch grid over both TCs
            vmem_limit_bytes=48 * 1024 * 1024,
        ),
        cost_estimate=cost,
    )(hid_s, wq_t, bq2, lens, key_s, val_s)

    return out[:B]


def attention_reference(key_arr, value_arr, speller_hidden, seq_len, wq, bq,
                        storage_dtype=jnp.bfloat16):
    """Plain-JAX mirror of the PyTorch forward (applying the same bf16 storage
    rounding the kernel uses), for verification."""
    f32 = jnp.float32
    k = key_arr.astype(storage_dtype).astype(f32)
    v = value_arr.astype(storage_dtype).astype(f32)
    h = speller_hidden.astype(storage_dtype).astype(f32)
    w = wq.astype(storage_dtype).astype(f32)
    B, T, D = k.shape
    q = jnp.dot(h, w.T, precision=lax.Precision.HIGHEST) + bq          # [B, 128]
    energy = jnp.sum(q[:, None, :] * k, axis=-1)                       # [B, T]
    s = jax.nn.softmax(energy, axis=-1)
    mask = (jnp.arange(T)[None, :] < seq_len[:, None]).astype(f32)
    masked = mask * s
    denom = jnp.maximum(jnp.sum(jnp.abs(masked), axis=-1, keepdims=True), 1e-12)
    attn = masked / denom
    return jnp.sum(attn[:, :, None] * v, axis=1)                       # [B, 128]


if __name__ == "__main__":
    B, T, D, H = 10, 16, 128, 512   # D=128, H=512 fixed by nn.Linear(512, 128)

    root = jax.random.PRNGKey(0)
    k_key, k_val, k_hid, k_w, k_b = jax.random.split(root, 5)

    key_arr = jax.random.normal(k_key, (B, T, D), dtype=jnp.float32)
    value_arr = jax.random.normal(k_val, (B, T, D), dtype=jnp.float32)
    speller_hidden = jax.random.normal(k_hid, (B, H), dtype=jnp.float32)
    # Mixes length < T and length >= T (exercises the ">= T" all-ones branch).
    seq_len = jnp.array([10, 20, 16, 3, 7, 16, 1, 12, 5, 16], dtype=jnp.int32)

    # Deterministic Linear(512, 128) params (PyTorch weight layout: [128, 512]).
    bound = 1.0 / jnp.sqrt(jnp.float32(H))
    wq = jax.random.uniform(k_w, (D, H), minval=-bound, maxval=bound, dtype=jnp.float32)
    bq = jax.random.uniform(k_b, (D,), minval=-bound, maxval=bound, dtype=jnp.float32)

    # block_b=8: B=10 is padded to 16 -> grid=(2,), exercising multi-block +
    # padded-row (seq_len=0) paths and megacore sharding.
    out = attention_forward(key_arr, value_arr, speller_hidden, seq_len, wq, bq,
                            block_b=8)
    out = jax.block_until_ready(out)

    ref = attention_reference(key_arr, value_arr, speller_hidden, seq_len, wq, bq)
    assert out.shape == (B, D)
    assert jnp.allclose(out, ref, atol=2e-3, rtol=2e-3), "mismatch vs reference"

    print("KERNEL_OK")
</pallas_src>

<mosaic_0001>
module attributes {stable_mosaic.version = 11 : i64} {
  func.func @attention_kernel(%arg0: i32, %arg1: memref<8x512xbf16, #tpu.memory_space<vmem>>, %arg2: memref<512x128xbf16, #tpu.memory_space<vmem>>, %arg3: memref<1x128xf32, #tpu.memory_space<vmem>>, %arg4: memref<8x1xi32, #tpu.memory_space<vmem>>, %arg5: memref<8x16x128xbf16, #tpu.memory_space<vmem>>, %arg6: memref<8x16x128xbf16, #tpu.memory_space<vmem>>, %arg7: memref<8x128xf32, #tpu.memory_space<vmem>>) attributes {dimension_semantics = [#tpu.dimension_semantics<parallel>], iteration_bounds = array<i64: 2>, scalar_prefetch = 0 : i64, scratch_operands = 0 : i64, tpu.core_type = #tpu.core_type<tc>, window_params = [{transform_indices = @transform_0, window_bounds = array<i64: 8, 512>}, {pipeline_mode = #tpu.pipeline_mode<synchronous>, transform_indices = @transform_1, window_bounds = array<i64: 512, 128>}, {pipeline_mode = #tpu.pipeline_mode<synchronous>, transform_indices = @transform_2, window_bounds = array<i64: 1, 128>}, {transform_indices = @transform_3, window_bounds = array<i64: 8, 1>}, {transform_indices = @transform_4, window_bounds = array<i64: 8, 16, 128>}, {transform_indices = @transform_5, window_bounds = array<i64: 8, 16, 128>}, {transform_indices = @transform_6, window_bounds = array<i64: 8, 128>}]} {
    %c0 = arith.constant 0 : index
    %c0_0 = arith.constant 0 : index
    %0 = vector.load %arg1[%c0, %c0_0] : memref<8x512xbf16, #tpu.memory_space<vmem>>, vector<8x512xbf16>
    %c0_1 = arith.constant 0 : index
    %c0_2 = arith.constant 0 : index
    %1 = vector.load %arg2[%c0_1, %c0_2] : memref<512x128xbf16, #tpu.memory_space<vmem>>, vector<512x128xbf16>
    %cst = arith.constant dense<0.000000e+00> : vector<8x128xf32>
    %2 = tpu.matmul %0, %1, %cst {dimension_numbers = #tpu.dot_dimension_numbers<[1], [0], [0], [1], [0, 0, 1, 1], [], []>} : vector<8x512xbf16>, vector<512x128xbf16>, vector<8x128xf32> -> vector<8x128xf32>
    %c0_3 = arith.constant 0 : index
    %c0_4 = arith.constant 0 : index
    %3 = vector.load %arg3[%c0_3, %c0_4] : memref<1x128xf32, #tpu.memory_space<vmem>>, vector<1x128xf32>
    %4 = vector.broadcast %3 : vector<1x128xf32> to vector<8x128xf32>
    %5 = arith.addf %2, %4 : vector<8x128xf32>
    %c0_5 = arith.constant 0 : index
    %c0_6 = arith.constant 0 : index
    %c0_7 = arith.constant 0 : index
    %6 = vector.load %arg5[%c0_5, %c0_6, %c0_7] : memref<8x16x128xbf16, #tpu.memory_space<vmem>>, vector<8x16x128xbf16>
    %7 = arith.extf %6 : vector<8x16x128xbf16> to vector<8x16x128xf32>
    %c0_8 = arith.constant 0 : index
    %c0_9 = arith.constant 0 : index
    %c0_10 = arith.constant 0 : index
    %8 = vector.load %arg6[%c0_8, %c0_9, %c0_10] : memref<8x16x128xbf16, #tpu.memory_space<vmem>>, vector<8x16x128xbf16>
    %9 = arith.extf %8 : vector<8x16x128xbf16> to vector<8x16x128xf32>
    %10 = vector.shape_cast %5 : vector<8x128xf32> to vector<8x1x128xf32>
    %11 = vector.broadcast %10 : vector<8x1x128xf32> to vector<8x16x128xf32>
    %12 = arith.mulf %11, %7 : vector<8x16x128xf32>
    %cst_11 = arith.constant dense<0.000000e+00> : vector<8x16xf32>
    %13 = vector.multi_reduction <add>, %12, %cst_11 [2] : vector<8x16x128xf32> to vector<8x16xf32>
    %cst_12 = arith.constant dense<0xFF800000> : vector<8xf32>
    %14 = vector.multi_reduction <maximumf>, %13, %cst_12 [1] : vector<8x16xf32> to vector<8xf32>
    %15 = vector.shape_cast %14 : vector<8xf32> to vector<8x1xf32>
    %16 = vector.broadcast %15 : vector<8x1xf32> to vector<8x16xf32>
    %17 = arith.subf %13, %16 : vector<8x16xf32>
    %18 = math.exp %17 : vector<8x16xf32>
    %19 = tpu.iota {dimensions = array<i32: 1>} : vector<8x16xi32>
    %c0_13 = arith.constant 0 : index
    %c0_14 = arith.constant 0 : index
    %20 = vector.load %arg4[%c0_13, %c0_14] : memref<8x1xi32, #tpu.memory_space<vmem>>, vector<8x1xi32>
    %21 = vector.broadcast %20 : vector<8x1xi32> to vector<8x16xi32>
    %22 = arith.cmpi slt, %19, %21 : vector<8x16xi32>
    %23 = arith.extui %22 : vector<8x16xi1> to vector<8x16xi32>
    %24 = arith.sitofp %23 : vector<8x16xi32> to vector<8x16xf32>
    %25 = arith.mulf %24, %18 : vector<8x16xf32>
    %cst_15 = arith.constant dense<0.000000e+00> : vector<8xf32>
    %26 = vector.multi_reduction <add>, %25, %cst_15 [1] : vector<8x16xf32> to vector<8xf32>
    %27 = vector.shape_cast %26 : vector<8xf32> to vector<8x1xf32>
    %cst_16 = arith.constant 9.99999996E-13 : f32
    %28 = vector.broadcast %cst_16 : f32 to vector<8x1xf32>
    %29 = arith.maximumf %27, %28 : vector<8x1xf32>
    %30 = tpu.reciprocal %29 {approx = true} : vector<8x1xf32> -> vector<8x1xf32>
    %31 = vector.broadcast %30 : vector<8x1xf32> to vector<8x16xf32>
    %32 = arith.mulf %25, %31 : vector<8x16xf32>
    %33 = vector.shape_cast %32 : vector<8x16xf32> to vector<8x16x1xf32>
    %34 = vector.broadcast %33 : vector<8x16x1xf32> to vector<8x16x128xf32>
    %35 = arith.mulf %34, %9 : vector<8x16x128xf32>
    %cst_17 = arith.constant dense<0.000000e+00> : vector<8x128xf32>
    %36 = vector.multi_reduction <add>, %35, %cst_17 [1] : vector<8x16x128xf32> to vector<8x128xf32>
    %c0_18 = arith.constant 0 : index
    %c0_19 = arith.constant 0 : index
    %37 = vector.load %arg7[%c0_18, %c0_19] : memref<8x128xf32, #tpu.memory_space<vmem>>, vector<8x128xf32>
    tpu.vector_store %arg7[%c0_18, %c0_19], %36 {strides = array<i32>} : memref<8x128xf32, #tpu.memory_space<vmem>>, vector<8x128xf32>,
    return
  }
  func.func @transform_0(%arg0: i32) -> (i32, i32) {
    %c0_i32 = arith.constant 0 : i32
    %c0_i32_0 = arith.constant 0 : i32
    return %arg0, %c0_i32 : i32, i32
  }
  func.func @transform_1(%arg0: i32) -> (i32, i32) {
    %c0_i32 = arith.constant 0 : i32
    %c0_i32_0 = arith.constant 0 : i32
    %c0_i32_1 = arith.constant 0 : i32
    return %c0_i32, %c0_i32_0 : i32, i32
  }
  func.func @transform_2(%arg0: i32) -> (i32, i32) {
    %c0_i32 = arith.constant 0 : i32
    %c0_i32_0 = arith.constant 0 : i32
    %c0_i32_1 = arith.constant 0 : i32
    return %c0_i32, %c0_i32_0 : i32, i32
  }
  func.func @transform_3(%arg0: i32) -> (i32, i32) {
    %c0_i32 = arith.constant 0 : i32
    %c0_i32_0 = arith.constant 0 : i32
    return %arg0, %c0_i32 : i32, i32
  }
  func.func @transform_4(%arg0: i32) -> (i32, i32, i32) {
    %c0_i32 = arith.constant 0 : i32
    %c0_i32_0 = arith.constant 0 : i32
    %c0_i32_1 = arith.constant 0 : i32
    return %arg0, %c0_i32, %c0_i32_0 : i32, i32, i32
  }
  func.func @transform_5(%arg0: i32) -> (i32, i32, i32) {
    %c0_i32 = arith.constant 0 : i32
    %c0_i32_0 = arith.constant 0 : i32
    %c0_i32_1 = arith.constant 0 : i32
    return %arg0, %c0_i32, %c0_i32_0 : i32, i32, i32
  }
  func.func @transform_6(%arg0: i32) -> (i32, i32) {
    %c0_i32 = arith.constant 0 : i32
    %c0_i32_0 = arith.constant 0 : i32
    return %arg0, %c0_i32 : i32, i32
  }
}

</mosaic_0001>

<bundles_post_ra>
// kernel: tpu_custom_call.1
= control target key start
LH: loop header
LB: loop body
LE: loop exit
PB: predicated region body
PF: predicated region fallthrough
CT: control target
= control target key end

     0   :  { %s2732_s0 = inlined_call_operand.hbm [shape: bf16[16,512], index: 0, kind: input, shape index: {}]   ;;  %s2733_s1 = inlined_call_operand.hbm [shape: bf16[512,128], index: 1, kind: input, shape index: {}]   ;;  %s2734_s2 = inlined_call_operand.vmem [shape: f32[1,128], index: 2, kind: input, shape index: {}]   ;;  %s2735_s3 = inlined_call_operand.vmem [shape: s32[16,1], index: 3, kind: input, shape index: {}]   ;;  %s2736_s4 = inlined_call_operand.hbm [shape: bf16[16,16,128], index: 4, kind: input, shape index: {}]   ;;  %s2737_s5 = inlined_call_operand.hbm [shape: bf16[16,16,128], index: 5, kind: input, shape index: {}]   ;;  %s2738_s6 = inlined_call_operand.hbm [shape: f32[16,128], index: 6, kind: output, shape index: {}]  }
   0x1   :  { %2749 = sst [smem:[#allocation14_spill]] %s2732_s0 }
   0x2   :  { %2750 = sst [smem:[#allocation15_spill]] %s2736_s4 }
   0x3   :  { %11 = vsyncpa [#allocation3], 0 }
   0x4   :  { %13 = vsyncpa [#allocation3 + $0x1], 0 }
   0x5   :  { %14 = vsyncpa [#allocation6], 0 }
   0x6   :  { %15 = vsyncpa [#allocation4], 0 }
   0x7   :  { %17 = vsyncpa [#allocation4 + $0x1], 0  ;;  %s2195_s21 = smov 0   ;;  %s2197_s22 = smov 0  }
   0x8   :  { %s2199_s23 = smov 0   ;;  %s2201_s24 = smov 0  }
   0x9 LB: > { %s2216_s25 = sadd.s32 1, %s2148_s24   ;;  %s30_s26 = sadd.s32 1, %s2144_s23  ;;  %s2148_s24 = sphi %s2201_s24, %s2776_s24   ;;  %s2144_s23 = sphi %s2199_s23, %s2775_s23   ;;  %s2140_s22 = sphi %s2197_s22, %s2774_s22   ;;  %s2136_s21 = sphi %s2195_s21, %s2773_s21  }
   0xa   : > { %s27_s27 = ssub.s32 %s2148_s24, %s2216_s25  ;;  %p2739_p0 = scmp.ne.s32.totalorder %s2144_s23, %s2140_s22 }
   0xb   : > { %p28_p1 = scmp.eq.s32.totalorder %s27_s27, 0  ;;  %p38_p2 = scmp.eq.s32.totalorder %s2148_s24, 0 }
   0xc   : > { %p1843_p4 = scmp.lt.s32.totalorder %s2148_s24, 2  ;;  %s229_s29 = sand.u32 1, %s2148_s24  }
   0xd   : > { %s2227_s28 = scalar_select %p28_p1, %s2144_s23, %s30_s26  }
   0xe   : > { %p39_p5 = por %p38_p2, %p2739_p0  ;;  %s231_s30 = sand.u32 1, %s2144_s23  }
   0xf   : > { %s1625_s7 = sshll.u32 %s231_s30, 4  ;;  %s1685_s8 = sshll.u32 %s2148_s24, 8 }
  0x10   : > { %s2751_s0 = sld [smem:[#allocation14_spill]]  ;;  %s233_s12 = scalar_lea.vmem [#allocation2], %s1625_s7 }
  0x11   : > { %s241_s13 = sshll.u32 %s233_s12, 4  ;;  %p2240_p6 = pnand %p1843_p4, %p39_p5  ;;  %s2244_s13 = int_to_ptr.vmem [resolvable:$true] %s241_s13 }
  0x12   : > { %s2246_s15 = sshll.u32 %s231_s30, 6  ;;  %s2248_s16 = scalar_lea.sflag [#allocation3], %s229_s29 }
  0x13   : > { %p2254_p8 = pneg %p2240_p6 }
  0x16   : > { %s2238_s11 = scalar_lea.hbm %s2751_s0, %s1685_s8  ;;  %s1961_s26 = scalar_lea.hbm %s2751_s0, 512 }
  0x17   : > { %s1956_s17 = scalar_lea.hbm %s2238_s11, 256  ;;  %p1962_p11 = scmp.lt.u32.totalorder %s2238_s11, %s2751_s0 }
  0x18   : > { %p1957_p7 = scmp.ne.s32.totalorder %s2238_s11, %s1956_s17  ;;  %p1963_p12 = scmp.lt.u32.totalorder %s1961_s26, %s1956_s17 }
  0x19   : > { %p1965_p1 = scmp.lt.u32.totalorder %s1956_s17, %s2238_s11 }
  0x1a   : > { %p1959_p9 = pnand %p2254_p8, %p1957_p7  ;;  %p1964_p13 = por %p1963_p12, %p1962_p11 }
  0x1c   : > { %p1960_p10 = pneg %p1959_p9  ;;  %p1966_p2 = por %p1965_p1, %p1964_p13 }
  0x1e   : > { %p1967_p4 = pnand %p1966_p2, %p1960_p10 }
  0x20   : > { %1970 = shalt.err (!%p1967_p4)
}
  0x21   : > { %s1971_s29 = scalar_lea.vmem %s2244_s13, 256  ;;  %s2150_s7 = smov [#allocation2]  }
  0x22   : > { %p1972_p5 = scmp.ne.s32.totalorder %s2244_s13, %s1971_s29  ;;  %s1976_s8 = sshll.u32 %s2150_s7, 4  ;;  %s1977_s8 = int_to_ptr.vmem [resolvable:$false] %s1976_s8 }
  0x23   : > { %s1978_s9 = scalar_lea.vmem %s1977_s8, 512  ;;  %p1979_p3 = scmp.lt.s32.totalorder %s2244_s13, %s1977_s8 }
  0x24   : > { %p1974_p7 = pnand %p1972_p5, %p2254_p8  ;;  %p1980_p0 = scmp.lt.s32.totalorder %s1978_s9, %s1971_s29 }
  0x26   : > { %p1975_p9 = pneg %p1974_p7  ;;  %p1981_p11 = por %p1980_p0, %p1979_p3 }
  0x28   : > { %p1982_p12 = pnand %p1981_p11, %p1975_p9 }
  0x2a   : > { %1985 = shalt.err (!%p1982_p12)
}
  0x2b   : > { %1831 = dma.hbm_to_vmem [thread:$0]  (!%p2240_p6), %s2238_s11, 256, %s2244_s13, %s2248_s16  }
  0x2c   : > { %s259_s10 = scalar_lea.vmem [#allocation7], %s2246_s15  ;;  %s281_s17 = scalar_lea.vmem [#allocation8], %s2246_s15 }
  0x2d   : > { %s267_s12 = sshll.u32 %s259_s10, 4  ;;  %s2282_s19 = sshll.u32 %s281_s17, 4  ;;  %s2279_s12 = int_to_ptr.vmem [resolvable:$true] %s267_s12  ;;  %s2345_s19 = int_to_ptr.vmem [resolvable:$true] %s2282_s19 }
  0x2e   : > { %s1687_s20 = sshll.u32 %s2148_s24, 10  ;;  %s2754_s4 = sld [smem:[#allocation15_spill]] }
  0x34   : > { %s2290_s30 = scalar_lea.hbm %s2754_s4, %s1687_s20  ;;  %s1991_s15 = scalar_lea.hbm %s2754_s4, 2048 }
  0x35   : > { %s1986_s29 = scalar_lea.hbm %s2290_s30, 1024  ;;  %p1992_p13 = scmp.lt.u32.totalorder %s2290_s30, %s2754_s4 }
  0x36   : > { %p1987_p0 = scmp.ne.s32.totalorder %s2290_s30, %s1986_s29  ;;  %p1993_p1 = scmp.lt.u32.totalorder %s1991_s15, %s1986_s29 }
  0x37   : > { %p1995_p4 = scmp.lt.u32.totalorder %s1986_s29, %s2290_s30 }
  0x38   : > { %p1989_p3 = pnand %p1987_p0, %p2254_p8  ;;  %p1994_p2 = por %p1993_p1, %p1992_p13 }
  0x3a   : > { %p1990_p10 = pneg %p1989_p3  ;;  %p1996_p5 = por %p1995_p4, %p1994_p2 }
  0x3c   : > { %p1997_p7 = pnand %p1996_p5, %p1990_p10 }
  0x3e   : > { %2000 = shalt.err (!%p1997_p7)
}
  0x3f   : > { %s2001_s9 = scalar_lea.vmem %s2279_s12, 1024  ;;  %s2151_s10 = smov [#allocation7]  }
  0x40   : > { %p2002_p9 = scmp.ne.s32.totalorder %s2279_s12, %s2001_s9  ;;  %s2006_s17 = sshll.u32 %s2151_s10, 4  ;;  %s2007_s17 = int_to_ptr.vmem [resolvable:$false] %s2006_s17 }
  0x41   : > { %s2008_s26 = scalar_lea.vmem %s2007_s17, 2048  ;;  %p2009_p0 = scmp.lt.s32.totalorder %s2279_s12, %s2007_s17 }
  0x42   : > { %p2004_p11 = pnand %p2002_p9, %p2254_p8  ;;  %p2010_p3 = scmp.lt.s32.totalorder %s2008_s26, %s2001_s9 }
  0x44   : > { %p2005_p12 = pneg %p2004_p11  ;;  %p2011_p13 = por %p2010_p3, %p2009_p0 }
  0x46   : > { %p2012_p1 = pnand %p2011_p13, %p2005_p12 }
  0x48   : > { %2015 = shalt.err (!%p2012_p1)
}
  0x49   : > { %s2740_s27 = smov 64   ;;  %s2742_s29 = smov 4  }
  0x4a   : > { %1834 = dma.hbm_to_vmem [thread:$0]  (!%p2240_p6), %s2290_s30, 1024, %s2279_s12, %s2248_s16, %s2740_s27, %s2740_s27, %s2742_s29  }
  0x4b   : > { %s2318_s11 = sadd.s32 4294967295, %s2148_s24   ;;  %s1621_s13 = sadd.s32 4294967294, %s2148_s24  }
  0x4c   : > { %p43_p10 = scmp.ne.s32.totalorder %s2140_s22, %s2136_s21  ;;  %p2744_p2 = scmp.eq.s32.totalorder %s2318_s11, 0 }
  0x4d   : > { %p187_p4 = scmp.eq.s32.totalorder %s2318_s11, 1  ;;  %p193_p5 = scmp.eq.s32.totalorder %s1621_s13, 1 }
  0x4e   : > { %p1622_p7 = scmp.ge.s32.totalorder %s2148_s24, 1  ;;  %p2328_p9 = por %p2744_p2, %p43_p10 }
  0x4f   : > { %p2756_p11 = scmp.ne.s32.totalorder %s2144_s23, %s2140_s22  ;;  %p2339_p0 = por %p193_p5, %p43_p10 }
  0x50   : > { %s2755_s15 = scalar_select %p2328_p9, 1, 0 }
  0x51   : > { %p2335_p12 = por %p187_p4, %p2756_p11  ;;  %p200_p3 = scmp.lt.s32.totalorder %s2148_s24, 3 }
  0x52   : > { %s2758_s30 = scalar_select %p2339_p0, 1, 0 }
  0x53   : > { %s2757_s12 = scalar_select %p2335_p12, 1, 0 }
  0x54   : > { %p2347_p13 = pnand %p1622_p7, %p200_p3  ;;  %s2154_s8 = smov [#allocation5]  }
  0x55   : > { %s2351_s9 = sshll.u32 %s2154_s8, 4  ;;  %s2358_s26 = scalar_lea.hbm %s2737_s5, %s1687_s20  ;;  %s213_s9 = int_to_ptr.vmem [resolvable:$true] %s2351_s9 }
  0x56   : > { %s2759_s7 = scalar_select %p2347_p13, 1, 0 }
  0x57   : > { %s2016_s13 = scalar_lea.hbm %s2358_s26, 1024  ;;  %s2021_s29 = scalar_lea.hbm %s2737_s5, 2048 }
  0x58   : > { %p2017_p10 = scmp.ne.s32.totalorder %s2358_s26, %s2016_s13  ;;  %p2022_p7 = scmp.lt.u32.totalorder %s2358_s26, %s2737_s5 }
  0x59   : > { %p2023_p11 = scmp.lt.u32.totalorder %s2021_s29, %s2016_s13  ;;  %p2025_p2 = scmp.lt.u32.totalorder %s2016_s13, %s2358_s26 }
  0x5a   : > { %p2019_p4 = pnand %p2017_p10, %p2254_p8 }
  0x5b   : > { %p2024_p3 = por %p2023_p11, %p2022_p7 }
  0x5c   : > { %p2020_p5 = pneg %p2019_p4 }
  0x5d   : > { %p2026_p0 = por %p2025_p2, %p2024_p3 }
  0x5f   : > { %p2027_p12 = pnand %p2026_p0, %p2020_p5 }
  0x61   : > { %2030 = shalt.err (!%p2027_p12)
}
  0x62   : > { %s2031_s20 = scalar_lea.vmem %s2345_s19, 1024  ;;  %s2155_s27 = smov [#allocation8]  }
  0x63   : > { %p2032_p10 = scmp.ne.s32.totalorder %s2345_s19, %s2031_s20  ;;  %s2036_s10 = sshll.u32 %s2155_s27, 4  ;;  %s2037_s10 = int_to_ptr.vmem [resolvable:$false] %s2036_s10 }
  0x64   : > { %s2038_s0 = scalar_lea.vmem %s2037_s10, 2048  ;;  %p2039_p9 = scmp.lt.s32.totalorder %s2345_s19, %s2037_s10 }
  0x65   : > { %p2034_p4 = pnand %p2032_p10, %p2254_p8  ;;  %p2040_p13 = scmp.lt.s32.totalorder %s2038_s0, %s2031_s20 }
  0x67   : > { %p2035_p1 = pneg %p2034_p4  ;;  %p2041_p7 = por %p2040_p13, %p2039_p9 }
  0x69   : > { %p2042_p11 = pnand %p2041_p7, %p2035_p1 }
  0x6b   : > { %2045 = shalt.err (!%p2042_p11)
}
  0x6c   : > { %s2760_s4 = smov 4   ;;  %s2761_s29 = smov 64  }
  0x6d   : > { %1837 = dma.hbm_to_vmem [thread:$0]  (!%p2240_p6), %s2358_s26, 1024, %s2345_s19, %s2248_s16, %s2761_s29, %s2761_s29, %s2760_s4  }
  0x6e   : > { %p2762_p8 = scmp.eq.s32.totalorder %s2318_s11, 0  ;;  %p2763_p2 = scmp.ne.s32.totalorder %s2759_s7, 0 }
  0x6f   : > { %s2046_s13 = scalar_lea.hbm %s2733_s1, 4096 }
  0x70   : > { %p2764_p12 = pneg %p2763_p2  ;;  %p2047_p9 = scmp.ne.s32.totalorder %s2733_s1, %s2046_s13 }
  0x71   : > { %p2053_p5 = scmp.lt.u32.totalorder %s2046_s13, %s2733_s1 }
  0x72   : > { %p2393_p0 = pnand %p2764_p12, %p2762_p8 }
  0x74   : > { %p2048_p13 = pneg %p2393_p0 }
  0x76   : > { %p2049_p6 = pnand %p2048_p13, %p2047_p9 }
  0x78   : > { %p2050_p1 = pneg %p2049_p6 }
  0x7a   : > { %p2055_p3 = pnand %p2053_p5, %p2050_p1 }
  0x7c   : > { %2058 = shalt.err (!%p2055_p3)
}
  0x7d   : > { %s2059_s26 = scalar_lea.vmem %s213_s9, 4096  ;;  %p2067_p11 = scmp.lt.s32.totalorder %s213_s9, %s213_s9 }
  0x7e   : > { %p2060_p10 = scmp.ne.s32.totalorder %s213_s9, %s2059_s26  ;;  %p2068_p8 = scmp.lt.s32.totalorder %s2059_s26, %s2059_s26 }
  0x80   : > { %p2062_p4 = pnand %p2060_p10, %p2048_p13  ;;  %p2069_p12 = por %p2068_p8, %p2067_p11 }
  0x82   : > { %p2063_p7 = pneg %p2062_p4 }
  0x84   : > { %p2070_p2 = pnand %p2069_p12, %p2063_p7 }
  0x86   : > { %2073 = shalt.err (!%p2070_p2)
}
  0x87   : > { %1827 = dma.hbm_to_vmem [thread:$0]  (!%p2393_p0), %s2733_s1, 4096, %s213_s9, [#allocation6], %s2761_s29, %s2761_s29, %s2760_s4  }
  0x88   : > { %p2766_p9 = scmp.ne.s32.totalorder %s2759_s7, 0 }
  0x89   : > { %s303_s0 = sand.u32 (!%p2766_p9), 1, %s2318_s11   ;;  %s2420_s17 = sand.u32 (!%p2766_p9), 1, %s2140_s22  }
  0x8a   : > { %301 = sbr.rel (%p2766_p9) target bundleno = 1285 (0x505), region = 44  ;;  %s1637_s14 = sshll.u32 (!%p2766_p9), %s2420_s17, 4 }
  0x8b   : > { %s304_s13 = scalar_lea.sflag (!%p2766_p9), [#allocation3], %s303_s0  ;;  %s2423_s18 = scalar_lea.vmem (!%p2766_p9), [#allocation2], %s1637_s14 }
  0x8c   : > { %p2767_p2 = scmp.ne.s32.totalorder (!%p2766_p9), %s2755_s15, 0 }
  0x91   : > { %2119 = dma.done.wait (%p2767_p2), %s304_s13, 256  }
  0x92   : > { %2121 = vsyncadd (%p2767_p2), %s304_s13, 4294967040  ;;  %p2768_p0 = scmp.eq.s32.totalorder %s2318_s11, 0 }
  0x94   : > { %2123 = dma.done.wait (%p2768_p0), [#allocation6], 4096   ;;  %p2769_p13 = pmov %p2768_p0 }
  0x95   : > { %s1639_s7 = sshll.u32 %s2420_s17, 6 }
  0x96   : > { %2125 = vsyncadd (%p2769_p13), [#allocation6], 4294963200  ;;  %s2436_s9 = scalar_lea.vmem [#allocation7], %s1639_s7 }
  0x97   : > { %2127 = dma.done.wait (%p2767_p2), %s304_s13, 2048  }
  0x98   : > { %2129 = vsyncadd (%p2767_p2), %s304_s13, 4294965248  ;;  %v1886_v0 = vld [vmem:[#allocation5 + $0x40] sm:$0xff]   ;;  %v1890_v4 = vld [vmem:[#allocation5 + $0x48] sm:$0xff]   ;;  %v2156_v38 = vmov 1966171168   ;;  %v807_v40 = vlaneseq  ;;  %vm967_vm0 = vcmask 130112  }
  0x99   : > { %v1887_v1 = vld [vmem:[#allocation5 + $0xc0] sm:$0xff]   ;;  %1768 = vmatprep.subr.bf16.mxu0 %v1886_v0  ;;  %v1891_v5 = vld [vmem:[#allocation5 + $0xc8] sm:$0xff]   ;;  %v1894_v8 = vld [vmem:[#allocation5 + $0x50] sm:$0xff]   ;;  %v805_v39 = vunpack.c.l.s4 %v2156_v38  ;;  %vm1032_vm1 = vcmask 1041409   ;;  %vm1034_vm2 = vcmask 1042434   ;;  %vm1036_vm3 = vcmask 1043459  }
  0x9a   : > { %v1888_v2 = vld [vmem:[#allocation5] sm:$0xff]   ;;  %1790 = vmatprep.subr.bf16.mxu1 %v1887_v1  ;;  %v1892_v6 = vld [vmem:[#allocation5 + $0x8] sm:$0xff]   ;;  %v1895_v9 = vld [vmem:[#allocation5 + $0xd0] sm:$0xff]   ;;  %v2445_v44 = vshrl.u32 %v807_v40, 7  ;;  %vm1038_vm4 = vcmask 1044484   ;;  %vm1040_vm5 = vcmask 1045509  }
  0x9b   : > { %v1889_v3 = vld [vmem:[#allocation5 + $0x80] sm:$0xff]   ;;  %1769 = vmatpush3.bf16.msra.mxu0 %v1888_v2  ;;  %v1893_v7 = vld [vmem:[#allocation5 + $0x88] sm:$0xff]   ;;  %v1896_v10 = vld [vmem:[#allocation5 + $0x10] sm:$0xff]   ;;  %v806_v43 = vunpack.c.0.s8 %v805_v39  ;;  %vm1042_vm6 = vcmask 1046534   ;;  %vm1044_vm7 = vcmask 1047559   ;;  %vm1047_vm8 = vcmask 130048  }
  0x9c   : > { %1791 = vmatpush3.bf16.msra.mxu1 %v1889_v3  ;;  %1770 = vmatprep.subr.bf16.mxu0 %v1890_v4  ;;  %v1897_v11 = vld [vmem:[#allocation5 + $0x90] sm:$0xff]   ;;  %v1898_v12 = vld [vmem:[#allocation5 + $0x58] sm:$0xff]   ;;  %v1902_v16 = vld [vmem:[#allocation5 + $0x60] sm:$0xff]   ;;  %v2453_v59 = vsub.s32 0, %v2445_v44  ;;  %p372_p6 = scmp.lt.s32.totalorder %s2318_s11, 1  ;;  %s2666_s26 = scalar_lea.vmem [#allocation8], %s1639_s7 }
  0x9d   : > { %1792 = vmatprep.subr.bf16.mxu1 %v1891_v5  ;;  %v1899_v13 = vld [vmem:[#allocation5 + $0xd8] sm:$0xff]   ;;  %v1903_v17 = vld [vmem:[#allocation5 + $0xe0] sm:$0xff]   ;;  %v1906_v20 = vld [vmem:[#allocation5 + $0x68] sm:$0xff]   ;;  %v809_v55 = vsub.s32 %v806_v43, %v2445_v44  ;;  %s1641_s27 = sshll.u32 %s2420_s17, 3  ;;  %s1682_s10 = sshll.u32 %s2318_s11, 7 }
  0x9e   : > { %v1900_v14 = vld [vmem:[#allocation5 + $0x18] sm:$0xff]   ;;  %v1904_v18 = vld [vmem:[#allocation5 + $0x20] sm:$0xff]   ;;  %v1907_v21 = vld [vmem:[#allocation5 + $0xe8] sm:$0xff]   ;;  %s373_s29 = scalar_select %p372_p6, %s2318_s11, 1 }
  0x9f   : > { %1771 = vmatpush3.bf16.msra.mxu0 %v1892_v6  ;;  %v1901_v15 = vld [vmem:[#allocation5 + $0x98] sm:$0xff]   ;;  %v1905_v19 = vld [vmem:[#allocation5 + $0xa0] sm:$0xff]   ;;  %v1908_v22 = vld [vmem:[#allocation5 + $0x28] sm:$0xff]   ;;  %s371_s0 = scalar_lea.vmem [#allocation9], %s1641_s27  ;;  %s2687_s7 = scalar_lea.hbm %s2738_s6, %s1682_s10 }
  0xa0   : > { %1793 = vmatpush3.bf16.msra.mxu1 %v1893_v7  ;;  %1772 = vmatprep.subr.bf16.mxu0 %v1894_v8  ;;  %v1909_v23 = vld [vmem:[#allocation5 + $0xa8] sm:$0xff]   ;;  %v1910_v24 = vld [vmem:[#allocation5 + $0x70] sm:$0xff]   ;;  %v1914_v28 = vld [vmem:[#allocation5 + $0x78] sm:$0xff]   ;;  %s1642_s8 = sshll.u32 %s373_s29, 3  ;;  %s1489_s14 = sshll.u32 %s371_s0, 4  ;;  %s2689_s14 = int_to_ptr.vmem [resolvable:$true] %s1489_s14 }
  0xa1   : > { %1794 = vmatprep.subr.bf16.mxu1 %v1895_v9  ;;  %v1911_v25 = vld [vmem:[#allocation5 + $0xf0] sm:$0xff]   ;;  %v1915_v29 = vld [vmem:[#allocation5 + $0xf8] sm:$0xff]   ;;  %v1643_v45 = vld [vmem:[%s2734_s2] ss:$0 sm:$0xff]  ;;  %s375_s19 = scalar_lea.vmem %s2735_s3, %s1642_s8  ;;  %s1476_s11 = scalar_lea.sflag [#allocation4], %s2420_s17 }
  0xa2   : > { %v1912_v26 = vld [vmem:[#allocation5 + $0x30] sm:$0xff]   ;;  %v1916_v30 = vld [vmem:[#allocation5 + $0x38] sm:$0xff]   ;;  %v1691_v57 = vld [vmem:[%s2436_s9] sm:$0xff]   ;;  %p2770_p5 = scmp.ne.s32.totalorder %s2757_s12, 0  ;;  %s2159_s15 = smov [#allocation9]  }
  0xa3   : > { %1773 = vmatpush3.bf16.msra.mxu0 %v1896_v10  ;;  %v1913_v27 = vld [vmem:[#allocation5 + $0xb0] sm:$0xff]   ;;  %v1917_v31 = vld [vmem:[#allocation5 + $0xb8] sm:$0xff]   ;;  %v1754_v60 = vld [vmem:[%s2436_s9 + $0x8] sm:$0xff]   ;;  %v1692_v62 = vunpack.c.l.bf16 %v1691_v57  ;;  %v1693_v4 = vunpack.c.h.bf16 %v1691_v57  ;;  %s2078_s4 = sshll.u32 %s2159_s15, 4  ;;  %s2079_s4 = int_to_ptr.vmem [resolvable:$false] %s2078_s4 }
  0xa4   : > { %1795 = vmatpush3.bf16.msra.mxu1 %v1897_v11  ;;  %1774 = vmatprep.subr.bf16.mxu0 %v1898_v12  ;;  %v379_v32 = vld [vmem:[%s2423_s18] sm:$0xff]  ;;  %v380_v33 = vld [vmem:[%s2423_s18 + $0x8] sm:$0xff]  ;;  %v1696_v2 = vunpack.c.l.bf16 %v1754_v60  ;;  %v1697_v11 = vunpack.c.h.bf16 %v1754_v60  ;;  %s2080_s29 = scalar_lea.vmem %s2079_s4, 256  ;;  %p2081_p4 = scmp.lt.s32.totalorder %s2689_s14, %s2079_s4 }
  0xa5   : > { %1796 = vmatprep.subr.bf16.mxu1 %v1899_v13  ;;  %v1644_v34 = vcombine.low %v379_v32, %v379_v32  ;;  %v1645_v35 = vcombine.high %v379_v32, %v379_v32  ;;  %v1646_v36 = vcombine.low %v380_v33, %v380_v33  ;;  %v1647_v37 = vcombine.high %v380_v33, %v380_v33  ;;  %v1755_v9 = vld [vmem:[%s2436_s9 + $0x10] sm:$0xff]  }
  0xa6   : > { %v1700_v13 = vunpack.c.l.bf16 %v1755_v9  ;;  %v1759_v38 = vld [vmem:[%s2436_s9 + $0x30] sm:$0xff]  }
  0xa7   : > { %1775 = vmatpush3.bf16.msra.mxu0 %v1900_v14  ;;  %690 = vmatprep.mubr.bf16.mxu0 %v1645_v35  ;;  %v1716_v43 = vunpack.c.l.bf16 %v1759_v38 }
  0xa8   : > { %1797 = vmatpush3.bf16.msra.mxu1 %v1901_v15  ;;  %1776 = vmatprep.subr.bf16.mxu0 %v1902_v16  ;;  %v1757_v15 = vld [vmem:[%s2436_s9 + $0x20] sm:$0xff]  }
  0xa9   : > { %1798 = vmatprep.subr.bf16.mxu1 %v1903_v17  ;;  %730 = vmatprep.mubr.bf16.mxu1 %v1647_v37 }
  0xab   : > { %1777 = vmatpush3.bf16.msra.mxu0 %v1904_v18  ;;  %v1701_v18 = vunpack.c.h.bf16 %v1755_v9 }
  0xac   : > { %1799 = vmatpush3.bf16.msra.mxu1 %v1905_v19  ;;  %1778 = vmatprep.subr.bf16.mxu0 %v1906_v20  ;;  %v1708_v19 = vunpack.c.l.bf16 %v1757_v15 }
  0xad   : > { %1800 = vmatprep.subr.bf16.mxu1 %v1907_v21 }
  0xaf   : > { %1779 = vmatpush3.bf16.msra.mxu0 %v1908_v22 }
  0xb0   : > { %1801 = vmatpush3.bf16.msra.mxu1 %v1909_v23  ;;  %1780 = vmatprep.subr.bf16.mxu0 %v1910_v24  ;;  %v1756_v24 = vld [vmem:[%s2436_s9 + $0x18] sm:$0xff]  }
  0xb1   : > { %1802 = vmatprep.subr.bf16.mxu1 %v1911_v25  ;;  %v1705_v33 = vunpack.c.h.bf16 %v1756_v24 }
  0xb3   : > { %1781 = vmatpush3.bf16.msra.mxu0 %v1912_v26  ;;  %v1709_v26 = vunpack.c.h.bf16 %v1757_v15 }
  0xb4   : > { %1803 = vmatpush3.bf16.msra.mxu1 %v1913_v27  ;;  %1782 = vmatprep.subr.bf16.mxu0 %v1914_v28  ;;  %v1704_v28 = vunpack.c.l.bf16 %v1756_v24 }
  0xb5   : > { %1804 = vmatprep.subr.bf16.mxu1 %v1915_v29 }
  0xb7   : > { %1783 = vmatpush3.bf16.msra.mxu0 %v1916_v30 }
  0xb8   : > { %1805 = vmatpush3.bf16.msra.mxu1 %v1917_v31  ;;  %v1758_v31 = vld [vmem:[%s2436_s9 + $0x28] sm:$0xff]  }
  0xb9   : > { %v1712_v35 = vunpack.c.l.bf16 %v1758_v31 }
  0xba   : > { %691 = vmatmul.mubr.bf16.vlgmr.msra.gmra.mrb[0].mxu0 %v1644_v34 }
  0xbb   : > { %731 = vmatmul.mubr.bf16.vlgmr.msra.gmra.mrb[0].mxu1 %v1646_v36 }
 0x18d   : > { %v1784_v41 = vpop.f32.mrb[0].mxu0 }
 0x18e   : > { %v1806_v42 = vpop.f32.mrb[0].mxu1  ;;  %v1785_v46 = vpop.f32.mrb[1].mxu0 }
 0x18f   : > { %v1807_v47 = vpop.f32.mrb[1].mxu1  ;;  %v1786_v48 = vadd.f32 %v1785_v46, %v1784_v41  ;;  %v1787_v50 = vpop.f32.mrb[2].mxu0  ;;  %v1713_v41 = vunpack.c.h.bf16 %v1758_v31 }
 0x190   : > { %v1808_v49 = vadd.f32 %v1807_v47, %v1806_v42  ;;  %v1809_v51 = vpop.f32.mrb[2].mxu1  ;;  %v1788_v52 = vpop.f32.mrb[3].mxu0  ;;  %v1760_v47 = vld [vmem:[%s2436_s9 + $0x38] sm:$0xff]   ;;  %s2074_s9 = scalar_lea.vmem %s2689_s14, 128 }
 0x191   : > { %v1810_v53 = vpop.f32.mrb[3].mxu1  ;;  %v693_v54 = vadd.f32 %v1786_v48, %v1643_v45  ;;  %v1720_v51 = vunpack.c.l.bf16 %v1760_v47  ;;  %p2075_p1 = scmp.ne.s32.totalorder %s2689_s14, %s2074_s9  ;;  %p2082_p7 = scmp.lt.s32.totalorder %s2080_s29, %s2074_s9 }
 0x193   : > { %v733_v56 = vadd.f32 %v1808_v49, %v693_v54  ;;  %v1717_v49 = vunpack.c.h.bf16 %v1759_v38  ;;  %v1721_v54 = vunpack.c.h.bf16 %v1760_v47  ;;  %v2157_v47 = vmov 0   ;;  %p2076_p3 = pnand %p2075_p1, %p2770_p5  ;;  %p2083_p11 = por %p2082_p7, %p2081_p4 }
 0x194   : > { %1885 = vset.pattern.permute.xlu0 %v2157_v47  ;;  %1884 = vset.pattern.permute.xlu1 %v2157_v47 }
 0x195   : > { %v810_v58 = vrot.slane %v733_v56, %v809_v55  ;;  %v803_v61 = vcombine.high %v733_v56, %v733_v56  ;;  %p2077_p10 = pneg %p2076_p3 }
 0x197   : > { %v826_v63 = vrot.slane %v810_v58, %v809_v55  ;;  %v818_v0 = vcombine.high %v810_v58, %v810_v58  ;;  %v817_v5 = vrot.slane %v803_v61, %v809_v55  ;;  %p2084_p8 = pnand %p2083_p11, %p2077_p10 }
 0x199   : > { %v855_v1 = vrot.slane %v826_v63, %v2453_v59  ;;  %v840_v3 = vrot.slane %v818_v0, %v809_v55  ;;  %v848_v8 = vcombine.high %v826_v63, %v826_v63  ;;  %v833_v16 = vrot.slane %v817_v5, %v809_v55 }
 0x19a   : > { %v819_v23 = vcombine.high %v817_v5, %v817_v5  ;;  %v2483_v0 = vand.u32 127, %v807_v40 }
 0x19b   : > { %v892_v6 = vmul.f32 %v1692_v62, %v855_v1  ;;  %v859_v7 = vrot.slane %v840_v3, %v2453_v59  ;;  %v893_v12 = vmul.f32 %v1693_v4, %v855_v1  ;;  %v863_v14 = vrot.slane %v848_v8, %v2453_v59 }
 0x19c   : > { %v871_v21 = vrot.slane %v833_v16, %v2453_v59  ;;  %v850_v22 = vcombine.high %v840_v3, %v840_v3  ;;  %v847_v30 = vrot.slane %v819_v23, %v809_v55  ;;  %v849_v37 = vcombine.high %v833_v16, %v833_v16 }
 0x19d   : > { %908 = vadd.xlane.f32.xlu0 %v892_v6  ;;  %v894_v10 = vmul.f32 %v1696_v2, %v859_v7  ;;  %v895_v17 = vmul.f32 %v1697_v11, %v859_v7  ;;  %v896_v20 = vmul.f32 %v1700_v13, %v863_v14  ;;  %v897_v25 = vmul.f32 %v1701_v18, %v863_v14 }
 0x19e   : > { %v900_v27 = vmul.f32 %v1708_v19, %v871_v21  ;;  %v867_v29 = vrot.slane %v850_v22, %v2453_v59  ;;  %v901_v32 = vmul.f32 %v1709_v26, %v871_v21  ;;  %v875_v36 = vrot.slane %v847_v30, %v2453_v59 }
 0x19f   : > { %912 = vadd.xlane.f32.xlu1 %v894_v10  ;;  %v879_v45 = vrot.slane %v849_v37, %v2453_v59  ;;  %v851_v46 = vcombine.high %v847_v30, %v847_v30  ;;  %v962_v2 = vadd.s32 4294967288, %v2483_v0  ;;  %v2499_v7 = vsub.s32 %v2483_v0, %v2445_v44 }
 0x1a0   : > { %v898_v34 = vmul.f32 %v1704_v28, %v867_v29  ;;  %v899_v39 = vmul.f32 %v1705_v33, %v867_v29  ;;  %v902_v42 = vmul.f32 %v1712_v35, %v875_v36  ;;  %v903_v48 = vmul.f32 %v1713_v41, %v875_v36 }
 0x1a1   : > { %910 = vadd.xlane.f32.xlu0 %v893_v12  ;;  %v904_v50 = vmul.f32 %v1716_v43, %v879_v45  ;;  %v883_v52 = vrot.slane %v851_v46, %v2453_v59  ;;  %v905_v53 = vmul.f32 %v1717_v49, %v879_v45  ;;  %v2493_v5 = vsub.s32 %v962_v2, %v2445_v44 }
 0x1a2   : > { %v1078_v2 = vsub.s32 6, %v2445_v44 }
 0x1a3   : > { %914 = vadd.xlane.f32.xlu1 %v895_v17  ;;  %v906_v55 = vmul.f32 %v1720_v51, %v883_v52  ;;  %v907_v56 = vmul.f32 %v1721_v54, %v883_v52  ;;  %v1074_v52 = vsub.s32 5, %v2445_v44 }
 0x1a5   : > { %916 = vadd.xlane.f32.xlu0 %v896_v20 }
 0x1a7   : > { %918 = vadd.xlane.f32.xlu1 %v897_v25 }
 0x1a9   : > { %924 = vadd.xlane.f32.xlu0 %v900_v27 }
 0x1ab   : > { %926 = vadd.xlane.f32.xlu1 %v901_v32 }
 0x1ad   : > { %920 = vadd.xlane.f32.xlu0 %v898_v34 }
 0x1af   : > { %922 = vadd.xlane.f32.xlu1 %v899_v39 }
 0x1b1   : > { %928 = vadd.xlane.f32.xlu0 %v902_v42 }
 0x1b3   : > { %930 = vadd.xlane.f32.xlu1 %v903_v48  ;;  %v1058_v48 = vsub.s32 1, %v2445_v44 }
 0x1b5   : > { %932 = vadd.xlane.f32.xlu0 %v904_v50 }
 0x1b7   : > { %934 = vadd.xlane.f32.xlu1 %v905_v53 }
 0x1b9   : > { %936 = vadd.xlane.f32.xlu0 %v906_v55  ;;  %v1062_v55 = vsub.s32 2, %v2445_v44 }
 0x1bb   : > { %938 = vadd.xlane.f32.xlu1 %v907_v56 }
 0x22a   : > { %v2470_v57 = vpop.xlane.xlu0 %908 }
 0x22b   : > { %v961_v15 = vrot.slane %v2470_v57, %v2499_v7 }
 0x22c   : > { %v2472_v58 = vpop.xlane.xlu1 %912 }
 0x22d   : > { %v972_v10 = vrot.slane %v2472_v58, %v2499_v7 }
 0x22e   : > { %v2474_v60 = vpop.xlane.xlu0 %910 }
 0x22f   : > { %v966_v11 = vrot.slane %v2474_v60, %v2493_v5 }
 0x230   : > { %v2476_v61 = vpop.xlane.xlu1 %914 }
 0x231   : > { %v976_v40 = vrot.slane %v2476_v61, %v2493_v5  ;;  %v968_v20 = vsel %vm967_vm0, %v966_v11, %v961_v15  ;;  %v1066_v15 = vsub.s32 3, %v2445_v44 }
 0x232   : > { %v2478_v62 = vpop.xlane.xlu0 %916 }
 0x233   : > { %v981_v13 = vrot.slane %v2478_v62, %v2499_v7  ;;  %v977_v16 = vsel %vm967_vm0, %v976_v40, %v972_v10 }
 0x234   : > { %v2480_v63 = vpop.xlane.xlu1 %918  ;;  %v1033_v23 = vsel %vm1032_vm1, %v977_v16, %v968_v20 }
 0x235   : > { %v985_v8 = vrot.slane %v2480_v63, %v2493_v5 }
 0x236   : > { %v2485_v1 = vpop.xlane.xlu0 %924 }
 0x237   : > { %v986_v18 = vsel %vm967_vm0, %v985_v8, %v981_v13  ;;  %v999_v29 = vrot.slane %v2485_v1, %v2499_v7 }
 0x238   : > { %v2488_v3 = vpop.xlane.xlu1 %926  ;;  %v1035_v26 = vsel %vm1034_vm2, %v986_v18, %v1033_v23 }
 0x239   : > { %v1003_v24 = vrot.slane %v2488_v3, %v2493_v5 }
 0x23a   : > { %v2490_v4 = vpop.xlane.xlu0 %920 }
 0x23b   : > { %v990_v17 = vrot.slane %v2490_v4, %v2499_v7  ;;  %v1004_v34 = vsel %vm967_vm0, %v1003_v24, %v999_v29 }
 0x23c   : > { %v2495_v6 = vpop.xlane.xlu1 %922 }
 0x23d   : > { %v994_v12 = vrot.slane %v2495_v6, %v2493_v5 }
 0x23e   : > { %v2505_v9 = vpop.xlane.xlu0 %928 }
 0x23f   : > { %v995_v21 = vsel %vm967_vm0, %v994_v12, %v990_v17  ;;  %v1008_v27 = vrot.slane %v2505_v9, %v2499_v7 }
 0x240   : > { %v2515_v14 = vpop.xlane.xlu1 %930  ;;  %v1037_v30 = vsel %vm1036_vm3, %v995_v21, %v1035_v26 }
 0x241   : > { %v1012_v22 = vrot.slane %v2515_v14, %v2493_v5  ;;  %v1039_v39 = vsel %vm1038_vm4, %v1004_v34, %v1037_v30 }
 0x242   : > { %v2523_v19 = vpop.xlane.xlu0 %932 }
 0x243   : > { %v1017_v31 = vrot.slane %v2523_v19, %v2499_v7  ;;  %v1013_v33 = vsel %vm967_vm0, %v1012_v22, %v1008_v27  ;;  %v1070_v27 = vsub.s32 4, %v2445_v44 }
 0x244   : > { %v2532_v25 = vpop.xlane.xlu1 %934  ;;  %v1041_v41 = vsel %vm1040_vm5, %v1013_v33, %v1039_v39 }
 0x245   : > { %v1021_v28 = vrot.slane %v2532_v25, %v2493_v5 }
 0x246   : > { %v2544_v32 = vpop.xlane.xlu0 %936 }
 0x247   : > { %v1022_v36 = vsel %vm967_vm0, %v1021_v28, %v1017_v31  ;;  %v1026_v37 = vrot.slane %v2544_v32, %v2499_v7 }
 0x248   : > { %v2548_v35 = vpop.xlane.xlu1 %938  ;;  %v1043_v43 = vsel %vm1042_vm6, %v1022_v36, %v1041_v41 }
 0x249   : > { %v1030_v38 = vrot.slane %v2548_v35, %v2493_v5 }
 0x24b   : > { %v1031_v42 = vsel %vm967_vm0, %v1030_v38, %v1026_v37 }
 0x24c   : > { %v1045_v45 = vsel %vm1044_vm7, %v1031_v42, %v1043_v43 }
 0x24d   : > { %v1048_v46 = vsel %vm1047_vm8, %v1045_v45, -inf }
 0x24e   : > { %1049 = vmax.xlane.f32.xlu0 %v1048_v46  ;;  %v1140_v46 = vld [vmem:[%s375_s19] sm:$0xff] }
 0x2db   : > { %v1050_v49 = vpop.xlane.xlu0 %1049 }
 0x2dc   : > { %v1055_v50 = vrot.slane %v1050_v49, %v2453_v59  ;;  %v1059_v51 = vrot.slane %v1050_v49, %v1058_v48  ;;  %v2573_v40 = vrot.slane %v1050_v49, %v1074_v52  ;;  %v1063_v11 = vrot.slane %v1050_v49, %v1062_v55 }
 0x2dd   : > { %v1067_v21 = vrot.slane %v1050_v49, %v1066_v15  ;;  %v1071_v30 = vrot.slane %v1050_v49, %v1070_v27 }
 0x2de   : > { %v1092_v53 = vsub.f32 %v2470_v57, %v1055_v50  ;;  %v1093_v54 = vsub.f32 %v2474_v60, %v1055_v50  ;;  %v1094_v56 = vsub.f32 %v2472_v58, %v1059_v51  ;;  %v1095_v12 = vsub.f32 %v2476_v61, %v1059_v51 }
 0x2df   : > { %v1082_v60 = vsub.s32 7, %v2445_v44  ;;  %v2581_v58 = vrot.slane %v1050_v49, %v1078_v2  ;;  %v1102_v13 = vsub.f32 %v2505_v9, %v2573_v40  ;;  %v1096_v16 = vsub.f32 %v2478_v62, %v1063_v11  ;;  %v1761_v44 = vld [vmem:[%s2666_s26 + $0x8] sm:$0xff]  }
 0x2e0   : > { %v1108_v8 = vmul.f32 1.442695, %v1092_v53  ;;  %v1110_v10 = vmul.f32 1.442695, %v1093_v54  ;;  %v1112_v57 = vmul.f32 1.442695, %v1094_v56  ;;  %v1097_v22 = vsub.f32 %v2480_v63, %v1063_v11 }
 0x2e1   : > { %v1114_v17 = vmul.f32 1.442695, %v1095_v12  ;;  %v2589_v61 = vrot.slane %v1050_v49, %v1082_v60  ;;  %v1104_v18 = vsub.f32 %v2523_v19, %v2581_v58  ;;  %v1128_v20 = vmul.f32 1.442695, %v1102_v13 }
 0x2e2   : > { %1922 = vpow2.f32 %v1108_v8  ;;  %v1116_v9 = vmul.f32 1.442695, %v1096_v16  ;;  %v1098_v19 = vsub.f32 %v2490_v4, %v1067_v21  ;;  %v1118_v28 = vmul.f32 1.442695, %v1097_v22 }
 0x2e3   : > { %1924 = vpow2.f32 %v1110_v10  ;;  %v1106_v62 = vsub.f32 %v2544_v32, %v2589_v61  ;;  %v1132_v24 = vmul.f32 1.442695, %v1104_v18  ;;  %v1099_v31 = vsub.f32 %v2495_v6, %v1067_v21 }
 0x2e4   : > { %1926 = vpow2.f32 %v1112_v57  ;;  %v1120_v32 = vmul.f32 1.442695, %v1098_v19  ;;  %v1100_v34 = vsub.f32 %v2485_v1, %v1071_v30  ;;  %v1101_v39 = vsub.f32 %v2488_v3, %v1071_v30 }
 0x2e5   : > { %1928 = vpow2.f32 %v1114_v17  ;;  %v1136_v63 = vmul.f32 1.442695, %v1106_v62  ;;  %v1122_v36 = vmul.f32 1.442695, %v1099_v31  ;;  %v1103_v42 = vsub.f32 %v2515_v14, %v2573_v40 }
 0x2e6   : > { %1930 = vpow2.f32 %v1128_v20  ;;  %v1124_v6 = vmul.f32 1.442695, %v1100_v34  ;;  %v1126_v43 = vmul.f32 1.442695, %v1101_v39  ;;  %v1105_v3 = vsub.f32 %v2532_v25, %v2581_v58 }
 0x2e7   : > { %1932 = vpow2.f32 %v1116_v9  ;;  %v1130_v47 = vmul.f32 1.442695, %v1103_v42  ;;  %v1107_v50 = vsub.f32 %v2548_v35, %v2589_v61 }
 0x2e8   : > { %1934 = vpow2.f32 %v1132_v24  ;;  %v1134_v51 = vmul.f32 1.442695, %v1105_v3 }
 0x2e9   : > { %1936 = vpow2.f32 %v1118_v28  ;;  %v1138_v53 = vmul.f32 1.442695, %v1107_v50 }
 0x2ea   : > { %1938 = vpow2.f32 %v1136_v63 }
 0x2eb   : > { %1940 = vpow2.f32 %v1120_v32 }
 0x2ec   : > { %v1923_v23 = vpop.eup %1922  ;;  %1942 = vpow2.f32 %v1122_v36 }
 0x2ed   : > { %v1925_v26 = vpop.eup %1924  ;;  %1164 = vperm.xlu1 %1884, %v1923_v23   ;;  %1944 = vpow2.f32 %v1124_v6 }
 0x2ee   : > { %1167 = vperm.xlu0 %1885, %v1925_v26   ;;  %v1927_v29 = vpop.eup %1926  ;;  %1946 = vpow2.f32 %v1126_v43 }
 0x2ef   : > { %v1929_v33 = vpop.eup %1928  ;;  %1948 = vpow2.f32 %v1130_v47 }
 0x2f0   : > { %v1931_v4 = vpop.eup %1930  ;;  %1950 = vpow2.f32 %v1134_v51 }
 0x2f1   : > { %1170 = vperm.xlu1 %1884, %v1927_v29   ;;  %v1933_v37 = vpop.eup %1932  ;;  %1952 = vpow2.f32 %v1138_v53  ;;  %v2158_v53 = vmov 0.0  }
 0x2f2   : > { %1194 = vperm.xlu0 %1885, %v1931_v4   ;;  %v1935_v38 = vpop.eup %1934 }
 0x2f3   : > { %v1937_v41 = vpop.eup %1936 }
 0x2f4   : > { %v1939_v1 = vpop.eup %1938 }
 0x2f5   : > { %1173 = vperm.xlu1 %1884, %v1929_v33   ;;  %v1941_v45 = vpop.eup %1940 }
 0x2f6   : > { %1200 = vperm.xlu0 %1885, %v1935_v38   ;;  %v1943_v49 = vpop.eup %1942 }
 0x2f7   : > { %v1945_v14 = vpop.eup %1944 }
 0x2f8   : > { %v1947_v54 = vpop.eup %1946 }
 0x2f9   : > { %1176 = vperm.xlu1 %1884, %v1933_v37   ;;  %v1949_v56 = vpop.eup %1948 }
 0x2fa   : > { %1206 = vperm.xlu0 %1885, %v1939_v1   ;;  %v1951_v25 = vpop.eup %1950 }
 0x2fb   : > { %v1953_v40 = vpop.eup %1952 }
 0x2fd   : > { %1179 = vperm.xlu1 %1884, %v1937_v41  }
 0x2fe   : > { %1142 = vperm.xlu0 %1885, %v1140_v46  }
 0x301   : > { %1182 = vperm.xlu1 %1884, %v1941_v45  }
 0x305   : > { %1185 = vperm.xlu1 %1884, %v1943_v49  }
 0x309   : > { %1188 = vperm.xlu1 %1884, %v1945_v14  }
 0x30d   : > { %1191 = vperm.xlu1 %1884, %v1947_v54  }
 0x311   : > { %1197 = vperm.xlu1 %1884, %v1949_v56  }
 0x315   : > { %1203 = vperm.xlu1 %1884, %v1951_v25  }
 0x319   : > { %1209 = vperm.xlu1 %1884, %v1953_v40  }
 0x36c   : > { %v1165_v8 = vpop.permute.xlu1 %1164 }
 0x36d   : > { %v1168_v57 = vpop.permute.xlu0 %1167  ;;  %v1214_v23 = vrot.slane %v1165_v8, %v2499_v7 }
 0x36e   : > { %v1218_v9 = vrot.slane %v1168_v57, %v2493_v5 }
 0x370   : > { %v1171_v10 = vpop.permute.xlu1 %1170  ;;  %v1219_v4 = vsel %vm967_vm0, %v1218_v9, %v1214_v23  ;;  %v1728_v23 = vunpack.c.l.bf16 %v1761_v44 }
 0x371   : > { %v1195_v16 = vpop.permute.xlu0 %1194  ;;  %v1223_v62 = vrot.slane %v1171_v10, %v2499_v7 }
 0x372   : > { %v1259_v34 = vrot.slane %v1195_v16, %v2499_v7 }
 0x374   : > { %v1174_v11 = vpop.permute.xlu1 %1173 }
 0x375   : > { %v1201_v61 = vpop.permute.xlu0 %1200  ;;  %v1227_v20 = vrot.slane %v1174_v11, %v2493_v5 }
 0x376   : > { %v1268_v38 = vrot.slane %v1201_v61, %v2499_v7  ;;  %v1723_v61 = vld [vmem:[%s2666_s26] sm:$0xff]  }
 0x377   : > { %v1228_v29 = vsel %vm967_vm0, %v1227_v20, %v1223_v62  ;;  %v1763_v20 = vld [vmem:[%s2666_s26 + $0x18] sm:$0xff]   ;;  %v1725_v9 = vunpack.c.h.bf16 %v1723_v61 }
 0x378   : > { %v1177_v12 = vpop.permute.xlu1 %1176  ;;  %v1283_v39 = vsel %vm1032_vm1, %v1228_v29, %v1219_v4  ;;  %v1737_v62 = vunpack.c.h.bf16 %v1763_v20  ;;  %v1736_v29 = vunpack.c.l.bf16 %v1763_v20 }
 0x379   : > { %v1207_v26 = vpop.permute.xlu0 %1206  ;;  %v1232_v19 = vrot.slane %v1177_v12, %v2499_v7 }
 0x37a   : > { %v1277_v3 = vrot.slane %v1207_v26, %v2499_v7 }
 0x37c   : > { %v1180_v35 = vpop.permute.xlu1 %1179 }
 0x37d   : > { %v1236_v21 = vrot.slane %v1180_v35, %v2493_v5  ;;  %v1143_v6 = vpop.permute.xlu0 %1142 }
 0x37e   : > { %vm1144_vm9 = vcmp.lt.s32.totalorder %v2483_v0, %v1143_v6 }
 0x37f   : > { %v1237_v31 = vsel %vm967_vm0, %v1236_v21, %v1232_v19  ;;  %v1680_v54 = vsel %vm1144_vm9, 1.0, %v2158_v53  ;;  %v1724_v19 = vunpack.c.l.bf16 %v1723_v61 }
 0x380   : > { %v1183_v58 = vpop.permute.xlu1 %1182  ;;  %v1284_v1 = vsel %vm1034_vm2, %v1237_v31, %v1283_v39 }
 0x381   : > { %v1241_v63 = vrot.slane %v1183_v58, %v2499_v7 }
 0x384   : > { %v1186_v13 = vpop.permute.xlu1 %1185 }
 0x385   : > { %v1245_v24 = vrot.slane %v1186_v13, %v2493_v5 }
 0x387   : > { %v1246_v36 = vsel %vm967_vm0, %v1245_v24, %v1241_v63 }
 0x388   : > { %v1189_v17 = vpop.permute.xlu1 %1188  ;;  %v1285_v43 = vsel %vm1036_vm3, %v1246_v36, %v1284_v1 }
 0x389   : > { %v1250_v32 = vrot.slane %v1189_v17, %v2499_v7 }
 0x38c   : > { %v1192_v18 = vpop.permute.xlu1 %1191 }
 0x38d   : > { %v1254_v28 = vrot.slane %v1192_v18, %v2493_v5 }
 0x38f   : > { %v1255_v41 = vsel %vm967_vm0, %v1254_v28, %v1250_v32 }
 0x390   : > { %v1198_v22 = vpop.permute.xlu1 %1197  ;;  %v1286_v47 = vsel %vm1038_vm4, %v1255_v41, %v1285_v43 }
 0x391   : > { %v1263_v30 = vrot.slane %v1198_v22, %v2493_v5  ;;  %v1764_v22 = vld [vmem:[%s2666_s26 + $0x20] sm:$0xff]  }
 0x392   : > { %v1740_v26 = vunpack.c.l.bf16 %v1764_v22  ;;  %v1741_v63 = vunpack.c.h.bf16 %v1764_v22 }
 0x393   : > { %v1264_v42 = vsel %vm967_vm0, %v1263_v30, %v1259_v34 }
 0x394   : > { %v1204_v33 = vpop.permute.xlu1 %1203  ;;  %v1287_v50 = vsel %vm1040_vm5, %v1264_v42, %v1286_v47 }
 0x395   : > { %v1272_v37 = vrot.slane %v1204_v33, %v2493_v5 }
 0x397   : > { %v1273_v45 = vsel %vm967_vm0, %v1272_v37, %v1268_v38  ;;  %v1765_v38 = vld [vmem:[%s2666_s26 + $0x28] sm:$0xff]  }
 0x398   : > { %v1210_v46 = vpop.permute.xlu1 %1209  ;;  %v1288_v14 = vsel %vm1042_vm6, %v1273_v45, %v1287_v50  ;;  %v1745_v47 = vunpack.c.h.bf16 %v1765_v38 }
 0x399   : > { %v1281_v49 = vrot.slane %v1210_v46, %v2493_v5 }
 0x39b   : > { %v1282_v51 = vsel %vm967_vm0, %v1281_v49, %v1277_v3  ;;  %v1744_v3 = vunpack.c.l.bf16 %v1765_v38 }
 0x39c   : > { %v1289_v56 = vsel %vm1044_vm7, %v1282_v51, %v1288_v14 }
 0x39d   : > { %v1291_v25 = vmul.f32 %v1680_v54, %v1289_v56 }
 0x39f   : > { %v1292_v40 = vsel %vm1047_vm8, %v1291_v25, 0.0 }
 0x3a0   : > { %1293 = vadd.xlane.f32.xlu1 %v1292_v40  ;;  %v1766_v40 = vld [vmem:[%s2666_s26 + $0x30] sm:$0xff]  }
 0x42d   : > { %v1294_v7 = vpop.xlane.xlu1 %1293 }
 0x42e   : > { %v1295_v0 = vmax.f32 %v1294_v7, 1e-12 }
 0x430   : > { %1954 = vrcp.f32 %v1295_v0 }
 0x43a   : > { %v1955_v8 = vpop.eup %1954 }
 0x43b   : > { %v1297_v10 = vmul.f32 %v1955_v8, %v1291_v25 }
 0x43d   : > { %v1345_v5 = vrot.slane %v1297_v10, %v1070_v27  ;;  %v1301_v11 = vrot.slane %v1297_v10, %v2453_v59  ;;  %v1378_v12 = vrot.slane %v1297_v10, %v1082_v60  ;;  %v1312_v35 = vrot.slane %v1297_v10, %v1058_v48 }
 0x43e   : > { %v1323_v57 = vrot.slane %v1297_v10, %v1062_v55  ;;  %v1334_v59 = vrot.slane %v1297_v10, %v1066_v15  ;;  %v1356_v60 = vrot.slane %v1297_v10, %v1074_v52  ;;  %v1367_v48 = vrot.slane %v1297_v10, %v1078_v2  ;;  %v1762_v2 = vld [vmem:[%s2666_s26 + $0x10] sm:$0xff]  }
 0x43f   : > { %1351 = vbcast.lane.b32.xlu1 %v1345_v5, 264  ;;  %1303 = vbcast.lane.b32.xlu0 %v1301_v11, 256  ;;  %v1729_v52 = vunpack.c.h.bf16 %v1761_v44  ;;  %v1733_v18 = vunpack.c.h.bf16 %v1762_v2  ;;  %v1732_v24 = vunpack.c.l.bf16 %v1762_v2 }
 0x443   : > { %1380 = vbcast.lane.b32.xlu1 %v1378_v12, 256  ;;  %1307 = vbcast.lane.b32.xlu0 %v1301_v11, 264 }
 0x447   : > { %1314 = vbcast.lane.b32.xlu0 %v1312_v35, 256 }
 0x44b   : > { %1318 = vbcast.lane.b32.xlu0 %v1312_v35, 264 }
 0x44f   : > { %1325 = vbcast.lane.b32.xlu0 %v1323_v57, 256 }
 0x453   : > { %1329 = vbcast.lane.b32.xlu0 %v1323_v57, 264 }
 0x457   : > { %1336 = vbcast.lane.b32.xlu0 %v1334_v59, 256 }
 0x45b   : > { %1340 = vbcast.lane.b32.xlu0 %v1334_v59, 264 }
 0x45f   : > { %1347 = vbcast.lane.b32.xlu0 %v1345_v5, 256  ;;  %v1748_v5 = vunpack.c.l.bf16 %v1766_v40 }
 0x463   : > { %1358 = vbcast.lane.b32.xlu0 %v1356_v60, 256 }
 0x467   : > { %1362 = vbcast.lane.b32.xlu0 %v1356_v60, 264  ;;  %v1749_v60 = vunpack.c.h.bf16 %v1766_v40 }
 0x46b   : > { %1369 = vbcast.lane.b32.xlu0 %v1367_v48, 256 }
 0x46f   : > { %1373 = vbcast.lane.b32.xlu0 %v1367_v48, 264 }
 0x473   : > { %1384 = vbcast.lane.b32.xlu0 %v1378_v12, 264  ;;  %v1767_v12 = vld [vmem:[%s2666_s26 + $0x38] sm:$0xff]  }
 0x4b1   : > { %v1304_v55 = vpop.permute.xlu0 %1303  ;;  %v1352_v32 = vpop.permute.xlu1 %1351 }
 0x4b2   : > { %v1386_v39 = vmul.f32 %v1724_v19, %v1304_v55  ;;  %v1395_v1 = vmul.f32 %v1741_v63, %v1352_v32 }
 0x4b5   : > { %v1308_v27 = vpop.permute.xlu0 %1307 }
 0x4b6   : > { %v1387_v33 = vmul.f32 %v1725_v9, %v1308_v27 }
 0x4b8   : > { %v1402_v45 = vadd.f32 %v1387_v33, %v1386_v39 }
 0x4b9   : > { %v1315_v58 = vpop.permute.xlu0 %1314 }
 0x4ba   : > { %v1388_v4 = vmul.f32 %v1728_v23, %v1315_v58  ;;  %v1403_v53 = vrot.slane %v1402_v45, 4  ;;  %v1752_v58 = vunpack.c.l.bf16 %v1767_v12 }
 0x4bc   : > { %v1404_v35 = vadd.f32 %v1403_v53, %v1402_v45 }
 0x4bd   : > { %v1319_v13 = vpop.permute.xlu0 %1318 }
 0x4be   : > { %v1389_v28 = vmul.f32 %v1729_v52, %v1319_v13  ;;  %v1405_v44 = vrot.slane %v1404_v35, 2 }
 0x4c0   : > { %v1409_v6 = vadd.f32 %v1389_v28, %v1388_v4 }
 0x4c1   : > { %v1326_v15 = vpop.permute.xlu0 %1325 }
 0x4c2   : > { %v1390_v36 = vmul.f32 %v1732_v24, %v1326_v15  ;;  %v1410_v50 = vrot.slane %v1409_v6, 4  ;;  %v1406_v24 = vadd.f32 %v1405_v44, %v1404_v35 }
 0x4c4   : > { %v1411_v0 = vadd.f32 %v1410_v50, %v1409_v6  ;;  %v1407_v4 = vrot.slane %v1406_v24, 1 }
 0x4c5   : > { %v1330_v16 = vpop.permute.xlu0 %1329 }
 0x4c6   : > { %v1391_v30 = vmul.f32 %v1733_v18, %v1330_v16  ;;  %v1412_v55 = vrot.slane %v1411_v0, 2  ;;  %v1753_v16 = vunpack.c.h.bf16 %v1767_v12 }
 0x4c8   : > { %v1416_v42 = vadd.f32 %v1391_v30, %v1390_v36  ;;  %v1413_v20 = vadd.f32 %v1412_v55, %v1411_v0 }
 0x4c9   : > { %v1337_v17 = vpop.permute.xlu0 %1336 }
 0x4ca   : > { %v1392_v41 = vmul.f32 %v1736_v29, %v1337_v17  ;;  %v1417_v51 = vrot.slane %v1416_v42, 4  ;;  %v1381_v17 = vpop.permute.xlu1 %1380  ;;  %v1414_v63 = vrot.slane %v1413_v20, 1 }
 0x4cb   : > { %v1400_v9 = vmul.f32 %v1752_v58, %v1381_v17 }
 0x4cc   : > { %v1418_v10 = vadd.f32 %v1417_v51, %v1416_v42  ;;  %v1415_v39 = vadd.f32 %v1414_v63, %v1413_v20 }
 0x4cd   : > { %v1341_v21 = vpop.permute.xlu0 %1340 }
 0x4ce   : > { %v1393_v34 = vmul.f32 %v1737_v62, %v1341_v21  ;;  %v1419_v13 = vrot.slane %v1418_v10, 2 }
 0x4d0   : > { %v1423_v46 = vadd.f32 %v1393_v34, %v1392_v41  ;;  %v1420_v23 = vadd.f32 %v1419_v13, %v1418_v10 }
 0x4d1   : > { %v1348_v31 = vpop.permute.xlu0 %1347 }
 0x4d2   : > { %v1394_v37 = vmul.f32 %v1740_v26, %v1348_v31  ;;  %v1424_v54 = vrot.slane %v1423_v46, 4  ;;  %v1421_v33 = vrot.slane %v1420_v23, 1 }
 0x4d4   : > { %v1430_v49 = vadd.f32 %v1395_v1, %v1394_v37  ;;  %v1425_v57 = vadd.f32 %v1424_v54, %v1423_v46  ;;  %v1422_v42 = vadd.f32 %v1421_v33, %v1420_v23 }
 0x4d5   : > { %v1359_v43 = vpop.permute.xlu0 %1358 }
 0x4d6   : > { %v1396_v56 = vmul.f32 %v1744_v3, %v1359_v43  ;;  %v1431_v7 = vrot.slane %v1430_v49, 4  ;;  %v1426_v52 = vrot.slane %v1425_v57, 2  ;;  %v1408_v43 = vadd.f32 %v1407_v4, %v1406_v24 }
 0x4d8   : > { %v1432_v48 = vadd.f32 %v1431_v7, %v1430_v49  ;;  %v1427_v26 = vadd.f32 %v1426_v52, %v1425_v57  ;;  %v1466_v49 = vsel %vm1032_vm1, %v1415_v39, %v1408_v43 }
 0x4d9   : > { %v1363_v14 = vpop.permute.xlu0 %1362 }
 0x4da   : > { %v1397_v25 = vmul.f32 %v1745_v47, %v1363_v14  ;;  %v1433_v18 = vrot.slane %v1432_v48, 2  ;;  %v1428_v34 = vrot.slane %v1427_v26, 1  ;;  %v1467_v14 = vsel %vm1034_vm2, %v1422_v42, %v1466_v49 }
 0x4dc   : > { %v1437_v8 = vadd.f32 %v1397_v25, %v1396_v56  ;;  %v1434_v29 = vadd.f32 %v1433_v18, %v1432_v48  ;;  %v1429_v45 = vadd.f32 %v1428_v34, %v1427_v26 }
 0x4dd   : > { %v1370_v11 = vpop.permute.xlu0 %1369 }
 0x4de   : > { %v1438_v59 = vrot.slane %v1437_v8, 4  ;;  %v1398_v2 = vmul.f32 %v1748_v5, %v1370_v11  ;;  %v1435_v38 = vrot.slane %v1434_v29, 1  ;;  %v1468_v54 = vsel %vm1036_vm3, %v1429_v45, %v1467_v14 }
 0x4e0   : > { %v1439_v27 = vadd.f32 %v1438_v59, %v1437_v8  ;;  %v1436_v47 = vadd.f32 %v1435_v38, %v1434_v29 }
 0x4e1   : > { %v1374_v15 = vpop.permute.xlu0 %1373 }
 0x4e2   : > { %v1399_v61 = vmul.f32 %v1749_v60, %v1374_v15  ;;  %v1440_v21 = vrot.slane %v1439_v27, 2  ;;  %v1469_v25 = vsel %vm1038_vm4, %v1436_v47, %v1468_v54 }
 0x4e4   : > { %v1444_v22 = vadd.f32 %v1399_v61, %v1398_v2  ;;  %v1441_v30 = vadd.f32 %v1440_v21, %v1439_v27 }
 0x4e5   : > { %v1385_v62 = vpop.permute.xlu0 %1384 }
 0x4e6   : > { %v1445_v19 = vrot.slane %v1444_v22, 4  ;;  %v1401_v28 = vmul.f32 %v1753_v16, %v1385_v62  ;;  %v1442_v6 = vrot.slane %v1441_v30, 1 }
 0x4e8   : > { %v1446_v31 = vadd.f32 %v1445_v19, %v1444_v22  ;;  %v1451_v32 = vadd.f32 %v1401_v28, %v1400_v9  ;;  %v1443_v50 = vadd.f32 %v1442_v6, %v1441_v30 }
 0x4ea   : > { %v1447_v36 = vrot.slane %v1446_v31, 2  ;;  %v1452_v37 = vrot.slane %v1451_v32, 4  ;;  %v1470_v7 = vsel %vm1040_vm5, %v1443_v50, %v1469_v25 }
 0x4ec   : > { %v1448_v41 = vadd.f32 %v1447_v36, %v1446_v31  ;;  %v1453_v1 = vadd.f32 %v1452_v37, %v1451_v32 }
 0x4ee   : > { %v1449_v46 = vrot.slane %v1448_v41, 1  ;;  %v1454_v3 = vrot.slane %v1453_v1, 2 }
 0x4f0   : > { %v1455_v51 = vadd.f32 %v1454_v3, %v1453_v1  ;;  %v1450_v53 = vadd.f32 %v1449_v46, %v1448_v41 }
 0x4f2   : > { %v1456_v56 = vrot.slane %v1455_v51, 1  ;;  %v1471_v0 = vsel %vm1042_vm6, %v1450_v53, %v1470_v7 }
 0x4f4   : > { %v1457_v40 = vadd.f32 %v1456_v56, %v1455_v51 }
 0x4f6   : > { %v1472_v8 = vsel %vm1044_vm7, %v1457_v40, %v1471_v0 }
 0x4f7   : > { %1474 = vst [vmem:[%s371_s0] sm:$0xff] %v1472_v8 }
 0x4f8   : > { %2087 = shalt.err (!%p2084_p8)
}
 0x4f9   : > { %s2088_s17 = scalar_lea.hbm %s2687_s7, 128  ;;  %s2092_s16 = scalar_lea.hbm %s2738_s6, 256 }
 0x4fa   : > { %p2089_p12 = scmp.ne.s32.totalorder %s2687_s7, %s2088_s17  ;;  %p2093_p0 = scmp.lt.u32.totalorder %s2687_s7, %s2738_s6 }
 0x4fb   : > { %p2094_p13 = scmp.lt.u32.totalorder %s2092_s16, %s2088_s17  ;;  %p2096_p1 = scmp.lt.u32.totalorder %s2088_s17, %s2687_s7 }
 0x4fc   : > { %p2090_p9 = pnand %p2089_p12, %p2770_p5 }
 0x4fd   : > { %p2095_p6 = por %p2094_p13, %p2093_p0 }
 0x4fe   : > { %p2091_p2 = pneg %p2090_p9 }
 0x4ff   : > { %p2097_p3 = por %p2096_p1, %p2095_p6 }
 0x501   : > { %p2098_p10 = pnand %p2097_p3, %p2091_p2 }
 0x503   : > { %2101 = shalt.err (!%p2098_p10)
}
 0x504   : > { %1822 = dma.vmem_to_hbm [thread:$0]  (%p2770_p5), %s2689_s14, 128, %s2687_s7, %s1476_s11  }
 0x505 PF: > { %s1501_s27 = sand.u32 1, %s2136_s21   ;;  %p2771_p4 = scmp.ne.s32.totalorder %s2758_s30, 0 }
 0x506   : > { %p2772_p7 = scmp.ge.s32.totalorder %s2148_s24, 2  ;;  %s1502_s10 = scalar_lea.sflag [#allocation4], %s1501_s27 }
 0x508   : > { %p1839_p11 = pnand %p2772_p7, %p2771_p4 }
 0x50a   : > { %2131 = dma.done.wait (!%p1839_p11), %s1502_s10, 128  }
 0x50b   : > { %2133 = vsyncadd (!%p1839_p11), %s1502_s10, 4294967168  ;;  %p20_p8 = scmp.ge.s32.totalorder %s2216_s25, 4   ;;  %s2773_s21 = smov %s2140_s22 }
 0x50c   : > { %s2774_s22 = smov %s2144_s23  ;;  %s2775_s23 = smov %s2227_s28 }
 0x50d   : > { %s2776_s24 = smov %s2216_s25  ;;  %22 = sbr.rel (!%p20_p8) target bundleno = 9 (0x9), region = 118 }
 0x514   :  { %1507 = vsyncpa [#allocation3], 1 }
 0x515   :  { %1509 = vsyncpa [#allocation3 + $0x1], 1 }
 0x516   :  { %1510 = vsyncpa [#allocation6], 1 }
 0x517   :  { %1511 = vsyncpa [#allocation4], 1 }
 0x518   :  { %1513 = vsyncpa [#allocation4 + $0x1], 1 }

</bundles_post_ra>
